<compile_context>
chip_gen: v7x
topology: tpu7x:2x2x1
jax: 0.10.0
libtpu: 0.0.40
codegen_flags: <defaults>
</compile_context>

<pallas_src>
import functools

import jax
import jax.numpy as jnp
from jax.experimental import pallas as pl
from jax.experimental.pallas import tpu as pltpu


# ---------------------------------------------------------------------------
# Fused kernel: phase 0 = conv + stats (y resident in VMEM), phase 1 = BN + ReLU
# ---------------------------------------------------------------------------
def _conv_bn_relu_kernel(p_ref, w_ref, g_ref, b_ref, o_ref,
                         y_sc, sum_sc, ssq_sc, scale_sc, bias_sc, *,
                         count, eps):
    # p_ref:  (1, K, Lp)   bf16  transposed im2col patches for image n
    # w_ref:  (Cout, K)    bf16  transposed/flattened conv weight
    # g_ref:  (Cout, 1)    f32   gamma
    # b_ref:  (Cout, 1)    f32   beta
    # o_ref:  (1, Cout, Lp)f32   NCHW-flattened output for image n (phase 1 only)
    # y_sc:   (N, Cout, Lp)f32   resident conv output for the whole batch
    # sum_sc/ssq_sc/scale_sc/bias_sc: (Cout, 1) f32 scratch
    phase = pl.program_id(0)
    n = pl.program_id(1)

    @pl.when(phase == 0)
    def _conv_and_stats():
        @pl.when(n == 0)
        def _init():
            sum_sc[...] = jnp.zeros_like(sum_sc)
            ssq_sc[...] = jnp.zeros_like(ssq_sc)

        # Single MXU contraction over K = kh*kw*Cin, f32 accumulation.
        yt = jnp.dot(w_ref[...], p_ref[0], preferred_element_type=jnp.float32)
        y_sc[n] = yt                                           # (Cout, Lp) f32
        sum_sc[...] += jnp.sum(yt, axis=1, keepdims=True)
        ssq_sc[...] += jnp.sum(yt * yt, axis=1, keepdims=True)

    @pl.when(phase == 1)
    def _bn_relu():
        @pl.when(n == 0)
        def _scale_bias():
            # TODO(synk): single-pass E[x^2]-E[x]^2 in f32; switch to a shifted /
            # Welford accumulation if |mean| >> std in real training.
            inv_cnt = 1.0 / count
            mean = sum_sc[...] * inv_cnt
            var = jnp.maximum(ssq_sc[...] * inv_cnt - mean * mean, 0.0)
            inv_std = jax.lax.rsqrt(var + eps)
            scale = g_ref[...] * inv_std
            scale_sc[...] = scale
            bias_sc[...] = b_ref[...] - mean * scale

        yt = y_sc[n]                                           # (Cout, Lp) f32
        o_ref[0] = jnp.maximum(yt * scale_sc[...] + bias_sc[...], 0.0)


def conv_block_forward(x, w, gamma, beta, *, stride=1, padding=0, eps=1e-5):
    """Conv2d(bias=False) + BatchNorm2d (training mode, batch stats) + ReLU (NCHW)."""
    N, Cin, H, W = x.shape
    Cout, _, kh, kw = w.shape
    Ho = (H + 2 * padding - kh) // stride + 1
    Wo = (W + 2 * padding - kw) // stride + 1
    Lp = Ho * Wo
    K = kh * kw * Cin
    count = float(N * Lp)

    # ---- transposed im2col in the wrapper (cheap at Cin<=32): (N, K, Lp) ----
    # K ordered (dh, dw, cin); stride/padding handled exactly once here.
    xp = jnp.pad(x, ((0, 0), (0, 0), (padding, padding), (padding, padding)))
    slices = []
    for dh in range(kh):
        for dw in range(kw):
            s_ = xp[:, :, dh:dh + (Ho - 1) * stride + 1:stride,
                          dw:dw + (Wo - 1) * stride + 1:stride]       # (N,Cin,Ho,Wo)
            slices.append(s_.reshape(N, Cin, Lp))
    patches_t = jnp.concatenate(slices, axis=1).astype(jnp.bfloat16)   # (N, K, Lp)

    # weight (Cout,Cin,kh,kw) -> (Cout, kh, kw, Cin) -> (Cout, K), same K ordering.
    wk_t = w.transpose(0, 2, 3, 1).reshape(Cout, K).astype(jnp.bfloat16)
    g2 = gamma.astype(jnp.float32).reshape(Cout, 1)
    b2 = beta.astype(jnp.float32).reshape(Cout, 1)

    kern = functools.partial(_conv_bn_relu_kernel, count=count, eps=eps)

    out_flat = pl.pallas_call(
        kern,
        out_shape=jax.ShapeDtypeStruct((N, Cout, Lp), jnp.float32),
        grid_spec=pltpu.PrefetchScalarGridSpec(
            num_scalar_prefetch=0,
            grid=(2, N),                     # (phase, image)
            in_specs=[
                # phase 1 pins block 0 so the unused patches are not re-fetched.
                pl.BlockSpec((1, K, Lp), lambda p, n: ((1 - p) * n, 0, 0)),
                pl.BlockSpec((Cout, K), lambda p, n: (0, 0)),
                pl.BlockSpec((Cout, 1), lambda p, n: (0, 0)),
                pl.BlockSpec((Cout, 1), lambda p, n: (0, 0)),
            ],
            # phase 0 parks on block 0 (never flushed mid-phase); each output block is
            # written exactly once, during phase 1.
            out_specs=pl.BlockSpec((1, Cout, Lp), lambda p, n: (p * n, 0, 0)),
            scratch_shapes=[
                pltpu.VMEM((N, Cout, Lp), jnp.float32),   # resident y (f32)
                pltpu.VMEM((Cout, 1), jnp.float32),       # sum
                pltpu.VMEM((Cout, 1), jnp.float32),       # sum of squares
                pltpu.VMEM((Cout, 1), jnp.float32),       # BN scale
                pltpu.VMEM((Cout, 1), jnp.float32),       # BN bias
            ],
        ),
        compiler_params=pltpu.CompilerParams(
            # TODO(synk): per-core partial stats (+ core barrier) would allow the image
            # axis to be "parallel" on v7x's 2 TensorCores; with a single shared stats
            # scratch it must stay sequential to avoid a race.
            dimension_semantics=("arbitrary", "arbitrary")),
    )(patches_t, wk_t, g2, b2)

    # Layout is already NCHW; this reshape is free metadata.
    return out_flat.reshape(N, Cout, Ho, Wo)


if __name__ == "__main__":
    # Shapes consistent with ConvBlock(in_c=4, out_c=8, k=3, s=1, p=1)
    N, Cin, H, W = 2, 4, 16, 16
    Cout, k, s, p = 8, 3, 1, 1

    key = jax.random.PRNGKey(0)
    kx, kwt, kg, kb = jax.random.split(key, 4)
    x = jax.random.normal(kx, (N, Cin, H, W), dtype=jnp.float32)
    w = 0.1 * jax.random.normal(kwt, (Cout, Cin, k, k), dtype=jnp.float32)
    gamma = 1.0 + 0.1 * jax.random.normal(kg, (Cout,), dtype=jnp.float32)
    beta = 0.1 * jax.random.normal(kb, (Cout,), dtype=jnp.float32)

    fwd = jax.jit(functools.partial(conv_block_forward, stride=s, padding=p))
    out = jax.block_until_ready(fwd(x, w, gamma, beta))

    # pure-JAX reference (conv + training-mode BN + relu).  The kernel rounds the
    # matmul operands to bf16 (MXU-native) but accumulates/normalizes in f32; mirror
    # the rounding so tolerance only absorbs accumulation-order differences.
    xb = x.astype(jnp.bfloat16).astype(jnp.float32)
    wb = w.astype(jnp.bfloat16).astype(jnp.float32)
    y_ref = jax.lax.conv_general_dilated(
        xb, wb, window_strides=(s, s), padding=[(p, p), (p, p)],
        dimension_numbers=("NCHW", "OIHW", "NCHW"))
    mean = y_ref.mean(axis=(0, 2, 3), keepdims=True)
    var = y_ref.var(axis=(0, 2, 3), keepdims=True)
    ref = jnp.maximum(
        (y_ref - mean) / jnp.sqrt(var + 1e-5) * gamma.reshape(1, -1, 1, 1)
        + beta.reshape(1, -1, 1, 1), 0.0)

    assert out.shape == (N, Cout, H, W), out.shape
    err = float(jnp.max(jnp.abs(out - ref)))
    assert err < 3e-2, err
    print("KERNEL_OK")
</pallas_src>

<mosaic_0001>
module attributes {stable_mosaic.version = 11 : i64} {
  func.func @_conv_bn_relu_kernel(%arg0: i32, %arg1: i32, %arg2: memref<1x36x256xbf16, #tpu.memory_space<vmem>>, %arg3: memref<8x36xbf16, #tpu.memory_space<vmem>>, %arg4: memref<8x1xf32, #tpu.memory_space<vmem>>, %arg5: memref<8x1xf32, #tpu.memory_space<vmem>>, %arg6: memref<1x8x256xf32, #tpu.memory_space<vmem>>, %arg7: memref<2x8x256xf32, #tpu.memory_space<vmem>>, %arg8: memref<8x1xf32, #tpu.memory_space<vmem>>, %arg9: memref<8x1xf32, #tpu.memory_space<vmem>>, %arg10: memref<8x1xf32, #tpu.memory_space<vmem>>, %arg11: memref<8x1xf32, #tpu.memory_space<vmem>>) attributes {dimension_semantics = [#tpu.dimension_semantics<arbitrary>, #tpu.dimension_semantics<arbitrary>], iteration_bounds = array<i64: 2, 2>, scalar_prefetch = 0 : i64, scratch_operands = 5 : i64, tpu.core_type = #tpu.core_type<tc>, window_params = [{transform_indices = @transform_0, window_bounds = array<i64: 1, 36, 256>}, {pipeline_mode = #tpu.pipeline_mode<synchronous>, transform_indices = @transform_1, window_bounds = array<i64: 8, 36>}, {pipeline_mode = #tpu.pipeline_mode<synchronous>, transform_indices = @transform_2, window_bounds = array<i64: 8, 1>}, {pipeline_mode = #tpu.pipeline_mode<synchronous>, transform_indices = @transform_3, window_bounds = array<i64: 8, 1>}, {transform_indices = @transform_4, window_bounds = array<i64: 1, 8, 256>}]} {
    %c0_i32 = arith.constant 0 : i32
    %0 = arith.cmpi eq, %arg0, %c0_i32 : i32
    %1 = arith.extui %0 : i1 to i32
    %c0_i32_0 = arith.constant 0 : i32
    %2 = arith.cmpi ne, %1, %c0_i32_0 : i32
    scf.if %2 {
      %c0_i32_2 = arith.constant 0 : i32
      %6 = arith.cmpi eq, %arg1, %c0_i32_2 : i32
      %7 = arith.extui %6 : i1 to i32
      %c0_i32_3 = arith.constant 0 : i32
      %8 = arith.cmpi ne, %7, %c0_i32_3 : i32
      scf.if %8 {
        %cst_20 = arith.constant 0.000000e+00 : f32
        %28 = vector.broadcast %cst_20 : f32 to vector<8x1xf32>
        %c0_21 = arith.constant 0 : index
        %c0_22 = arith.constant 0 : index
        %29 = vector.load %arg8[%c0_21, %c0_22] : memref<8x1xf32, #tpu.memory_space<vmem>>, vector<8x1xf32>
        tpu.vector_store %arg8[%c0_21, %c0_22], %28 {strides = array<i32>} : memref<8x1xf32, #tpu.memory_space<vmem>>, vector<8x1xf32>,
        %cst_23 = arith.constant 0.000000e+00 : f32
        %30 = vector.broadcast %cst_23 : f32 to vector<8x1xf32>
        %c0_24 = arith.constant 0 : index
        %c0_25 = arith.constant 0 : index
        %31 = vector.load %arg9[%c0_24, %c0_25] : memref<8x1xf32, #tpu.memory_space<vmem>>, vector<8x1xf32>
        tpu.vector_store %arg9[%c0_24, %c0_25], %30 {strides = array<i32>} : memref<8x1xf32, #tpu.memory_space<vmem>>, vector<8x1xf32>,
      } else {
      }
      %c0 = arith.constant 0 : index
      %c0_4 = arith.constant 0 : index
      %9 = vector.load %arg3[%c0, %c0_4] : memref<8x36xbf16, #tpu.memory_space<vmem>>, vector<8x36xbf16>
      %c0_5 = arith.constant 0 : index
      %c0_6 = arith.constant 0 : index
      %c0_7 = arith.constant 0 : index
      %10 = vector.load %arg2[%c0_5, %c0_6, %c0_7] : memref<1x36x256xbf16, #tpu.memory_space<vmem>>, vector<1x36x256xbf16>
      %11 = vector.shape_cast %10 : vector<1x36x256xbf16> to vector<36x256xbf16>
      %cst = arith.constant dense<0.000000e+00> : vector<8x256xf32>
      %12 = tpu.matmul %9, %11, %cst {dimension_numbers = #tpu.dot_dimension_numbers<[1], [0], [0], [1], [0, 0, 1, 1], [], []>} : vector<8x36xbf16>, vector<36x256xbf16>, vector<8x256xf32> -> vector<8x256xf32>
      %13 = arith.index_cast %arg1 : i32 to index
      %c0_8 = arith.constant 0 : index
      %c0_9 = arith.constant 0 : index
      %14 = vector.load %arg7[%13, %c0_8, %c0_9] : memref<2x8x256xf32, #tpu.memory_space<vmem>>, vector<1x8x256xf32>
      %15 = vector.shape_cast %14 : vector<1x8x256xf32> to vector<8x256xf32>
      %16 = vector.shape_cast %12 : vector<8x256xf32> to vector<1x8x256xf32>
      tpu.vector_store %arg7[%13, %c0_8, %c0_9], %16 {strides = array<i32>} : memref<2x8x256xf32, #tpu.memory_space<vmem>>, vector<1x8x256xf32>,
      %c0_10 = arith.constant 0 : index
      %c0_11 = arith.constant 0 : index
      %17 = vector.load %arg8[%c0_10, %c0_11] : memref<8x1xf32, #tpu.memory_space<vmem>>, vector<8x1xf32>
      %cst_12 = arith.constant dense<0.000000e+00> : vector<8xf32>
      %18 = vector.multi_reduction <add>, %12, %cst_12 [1] : vector<8x256xf32> to vector<8xf32>
      %19 = vector.shape_cast %18 : vector<8xf32> to vector<8x1xf32>
      %20 = arith.addf %17, %19 : vector<8x1xf32>
      %c0_13 = arith.constant 0 : index
      %c0_14 = arith.constant 0 : index
      %21 = vector.load %arg8[%c0_13, %c0_14] : memref<8x1xf32, #tpu.memory_space<vmem>>, vector<8x1xf32>
      tpu.vector_store %arg8[%c0_13, %c0_14], %20 {strides = array<i32>} : memref<8x1xf32, #tpu.memory_space<vmem>>, vector<8x1xf32>,
      %c0_15 = arith.constant 0 : index
      %c0_16 = arith.constant 0 : index
      %22 = vector.load %arg9[%c0_15, %c0_16] : memref<8x1xf32, #tpu.memory_space<vmem>>, vector<8x1xf32>
      %23 = arith.mulf %12, %12 : vector<8x256xf32>
      %cst_17 = arith.constant dense<0.000000e+00> : vector<8xf32>
      %24 = vector.multi_reduction <add>, %23, %cst_17 [1] : vector<8x256xf32> to vector<8xf32>
      %25 = vector.shape_cast %24 : vector<8xf32> to vector<8x1xf32>
      %26 = arith.addf %22, %25 : vector<8x1xf32>
      %c0_18 = arith.constant 0 : index
      %c0_19 = arith.constant 0 : index
      %27 = vector.load %arg9[%c0_18, %c0_19] : memref<8x1xf32, #tpu.memory_space<vmem>>, vector<8x1xf32>
      tpu.vector_store %arg9[%c0_18, %c0_19], %26 {strides = array<i32>} : memref<8x1xf32, #tpu.memory_space<vmem>>, vector<8x1xf32>,
    } else {
    }
    %c1_i32 = arith.constant 1 : i32
    %3 = arith.cmpi eq, %arg0, %c1_i32 : i32
    %4 = arith.extui %3 : i1 to i32
    %c0_i32_1 = arith.constant 0 : i32
    %5 = arith.cmpi ne, %4, %c0_i32_1 : i32
    scf.if %5 {
      %c0_i32_2 = arith.constant 0 : i32
      %6 = arith.cmpi eq, %arg1, %c0_i32_2 : i32
      %7 = arith.extui %6 : i1 to i32
      %c0_i32_3 = arith.constant 0 : i32
      %8 = arith.cmpi ne, %7, %c0_i32_3 : i32
      scf.if %8 {
        %c0_12 = arith.constant 0 : index
        %c0_13 = arith.constant 0 : index
        %23 = vector.load %arg8[%c0_12, %c0_13] : memref<8x1xf32, #tpu.memory_space<vmem>>, vector<8x1xf32>
        %cst_14 = arith.constant 0.001953125 : f32
        %24 = vector.broadcast %cst_14 : f32 to vector<8x1xf32>
        %25 = arith.mulf %23, %24 : vector<8x1xf32>
        %c0_15 = arith.constant 0 : index
        %c0_16 = arith.constant 0 : index
        %26 = vector.load %arg9[%c0_15, %c0_16] : memref<8x1xf32, #tpu.memory_space<vmem>>, vector<8x1xf32>
        %cst_17 = arith.constant 0.001953125 : f32
        %27 = vector.broadcast %cst_17 : f32 to vector<8x1xf32>
        %28 = arith.mulf %26, %27 : vector<8x1xf32>
        %29 = arith.mulf %25, %25 : vector<8x1xf32>
        %30 = arith.subf %28, %29 : vector<8x1xf32>
        %cst_18 = arith.constant 0.000000e+00 : f32
        %31 = vector.broadcast %cst_18 : f32 to vector<8x1xf32>
        %32 = arith.maximumf %30, %31 : vector<8x1xf32>
        %cst_19 = arith.constant 9.99999974E-6 : f32
        %33 = vector.broadcast %cst_19 : f32 to vector<8x1xf32>
        %34 = arith.addf %32, %33 : vector<8x1xf32>
        %35 = math.rsqrt %34 : vector<8x1xf32>
        %c0_20 = arith.constant 0 : index
        %c0_21 = arith.constant 0 : index
        %36 = vector.load %arg4[%c0_20, %c0_21] : memref<8x1xf32, #tpu.memory_space<vmem>>, vector<8x1xf32>
        %37 = arith.mulf %36, %35 : vector<8x1xf32>
        %c0_22 = arith.constant 0 : index
        %c0_23 = arith.constant 0 : index
        %38 = vector.load %arg10[%c0_22, %c0_23] : memref<8x1xf32, #tpu.memory_space<vmem>>, vector<8x1xf32>
        tpu.vector_store %arg10[%c0_22, %c0_23], %37 {strides = array<i32>} : memref<8x1xf32, #tpu.memory_space<vmem>>, vector<8x1xf32>,
        %c0_24 = arith.constant 0 : index
        %c0_25 = arith.constant 0 : index
        %39 = vector.load %arg5[%c0_24, %c0_25] : memref<8x1xf32, #tpu.memory_space<vmem>>, vector<8x1xf32>
        %40 = arith.mulf %25, %37 : vector<8x1xf32>
        %41 = arith.subf %39, %40 : vector<8x1xf32>
        %c0_26 = arith.constant 0 : index
        %c0_27 = arith.constant 0 : index
        %42 = vector.load %arg11[%c0_26, %c0_27] : memref<8x1xf32, #tpu.memory_space<vmem>>, vector<8x1xf32>
        tpu.vector_store %arg11[%c0_26, %c0_27], %41 {strides = array<i32>} : memref<8x1xf32, #tpu.memory_space<vmem>>, vector<8x1xf32>,
      } else {
      }
      %9 = arith.index_cast %arg1 : i32 to index
      %c0 = arith.constant 0 : index
      %c0_4 = arith.constant 0 : index
      %10 = vector.load %arg7[%9, %c0, %c0_4] : memref<2x8x256xf32, #tpu.memory_space<vmem>>, vector<1x8x256xf32>
      %11 = vector.shape_cast %10 : vector<1x8x256xf32> to vector<8x256xf32>
      %c0_5 = arith.constant 0 : index
      %c0_6 = arith.constant 0 : index
      %12 = vector.load %arg10[%c0_5, %c0_6] : memref<8x1xf32, #tpu.memory_space<vmem>>, vector<8x1xf32>
      %13 = vector.broadcast %12 : vector<8x1xf32> to vector<8x256xf32>
      %14 = arith.mulf %11, %13 : vector<8x256xf32>
      %c0_7 = arith.constant 0 : index
      %c0_8 = arith.constant 0 : index
      %15 = vector.load %arg11[%c0_7, %c0_8] : memref<8x1xf32, #tpu.memory_space<vmem>>, vector<8x1xf32>
      %16 = vector.broadcast %15 : vector<8x1xf32> to vector<8x256xf32>
      %17 = arith.addf %14, %16 : vector<8x256xf32>
      %cst = arith.constant 0.000000e+00 : f32
      %18 = vector.broadcast %cst : f32 to vector<8x256xf32>
      %19 = arith.maximumf %17, %18 : vector<8x256xf32>
      %c0_9 = arith.constant 0 : index
      %c0_10 = arith.constant 0 : index
      %c0_11 = arith.constant 0 : index
      %20 = vector.load %arg6[%c0_9, %c0_10, %c0_11] : memref<1x8x256xf32, #tpu.memory_space<vmem>>, vector<1x8x256xf32>
      %21 = vector.shape_cast %20 : vector<1x8x256xf32> to vector<8x256xf32>
      %22 = vector.shape_cast %19 : vector<8x256xf32> to vector<1x8x256xf32>
      tpu.vector_store %arg6[%c0_9, %c0_10, %c0_11], %22 {strides = array<i32>} : memref<1x8x256xf32, #tpu.memory_space<vmem>>, vector<1x8x256xf32>,
    } else {
    }
    return
  }
  func.func @transform_0(%arg0: i32, %arg1: i32) -> (i32, i32, i32) {
    %c1_i32 = arith.constant 1 : i32
    %0 = arith.subi %c1_i32, %arg0 : i32
    %1 = arith.muli %0, %arg1 : i32
    %c0_i32 = arith.constant 0 : i32
    %c0_i32_0 = arith.constant 0 : i32
    %c0_i32_1 = arith.constant 0 : i32
    return %1, %c0_i32, %c0_i32_0 : i32, i32, i32
  }
  func.func @transform_1(%arg0: i32, %arg1: i32) -> (i32, i32) {
    %c0_i32 = arith.constant 0 : i32
    %c0_i32_0 = arith.constant 0 : i32
    %c0_i32_1 = arith.constant 0 : i32
    return %c0_i32, %c0_i32_0 : i32, i32
  }
  func.func @transform_2(%arg0: i32, %arg1: i32) -> (i32, i32) {
    %c0_i32 = arith.constant 0 : i32
    %c0_i32_0 = arith.constant 0 : i32
    %c0_i32_1 = arith.constant 0 : i32
    return %c0_i32, %c0_i32_0 : i32, i32
  }
  func.func @transform_3(%arg0: i32, %arg1: i32) -> (i32, i32) {
    %c0_i32 = arith.constant 0 : i32
    %c0_i32_0 = arith.constant 0 : i32
    %c0_i32_1 = arith.constant 0 : i32
    return %c0_i32, %c0_i32_0 : i32, i32
  }
  func.func @transform_4(%arg0: i32, %arg1: i32) -> (i32, i32, i32) {
    %0 = arith.muli %arg0, %arg1 : i32
    %c0_i32 = arith.constant 0 : i32
    %c0_i32_0 = arith.constant 0 : i32
    %c0_i32_1 = arith.constant 0 : i32
    return %0, %c0_i32, %c0_i32_0 : i32, i32, i32
  }
}

</mosaic_0001>

<bundles_post_ra>
// kernel: conv_block_forward.1
= control target key start
LH: loop header
LB: loop body
LE: loop exit
PB: predicated region body
PF: predicated region fallthrough
CT: control target
= control target key end

     0   :  { %s620_s15 = smov 0   ;;  %s622_s16 = smov 0   ;;  %s698_s0 = inlined_call_operand.vmem [shape: bf16[2,36,256], index: 0, kind: input, shape index: {}]   ;;  %s699_s1 = inlined_call_operand.vmem [shape: bf16[8,36], index: 1, kind: input, shape index: {}]   ;;  %s700_s2 = inlined_call_operand.vmem [shape: f32[8,1], index: 2, kind: input, shape index: {}]   ;;  %s701_s3 = inlined_call_operand.vmem [shape: f32[8,1], index: 3, kind: input, shape index: {}]   ;;  %s702_s4 = inlined_call_operand.vmem [shape: f32[2,8,256], index: 4, kind: output, shape index: {}]  }
   0x1   :  { %s624_s17 = smov 0   ;;  %s626_s18 = smov 0  }
   0x2   :  { %s628_s19 = smov 0  }
   0x3 LB: > { %s23_s20 = sadd.s32 1, %s582_s17  ;;  %s26_s21 = sadd.s32 1, %s586_s18  ;;  %s590_s19 = sphi %s628_s19, %s14_s19   ;;  %s586_s18 = sphi %s626_s18, %s706_s18   ;;  %s582_s17 = sphi %s624_s17, %s705_s17   ;;  %s578_s16 = sphi %s622_s16, %s704_s16   ;;  %s574_s15 = sphi %s620_s15, %s703_s15  }
   0x4   : > { %p24_p0 = scmp.ge.s32.totalorder %s23_s20, 2  ;;  %p472_p1 = scmp.ge.s32.totalorder %s590_s19, 1 }
   0x5   : > { %p184_p2 = scmp.lt.s32.totalorder %s590_s19, 5 }
   0x6   : > { %s708_s20 = smov (%p24_p0, %s23_s20), 0  ;;  %s710_s21 = smov (!%p24_p0, %s26_s21), %s586_s18 }
   0x7   : > { %p185_p3 = pnand %p472_p1, %p184_p2  ;;  %p28_p4 = scmp.ge.s32.totalorder %s710_s21, 2 }
   0x8   : > { %s213_s22 = ssub.s32 (!%p185_p3), 1, %s578_s16  ;;  %s222_s23 = smul.u32 (!%p185_p3), %s574_s15, %s578_s16 }
   0x9   : > { %s712_s21 = smov (%p28_p4, %s710_s21), 0  ;;  %188 = sbr.rel (%p185_p3) target bundleno = 587 (0x24b), region = 36 }
   0xa   : > { %s214_s24 = smul.u32 (!%p185_p3), %s574_s15, %s213_s22  ;;  %p223_p5 = scmp.lt.s32.totalorder (!%p185_p3), %s222_s23, 1 }
   0xb   : > { %p476_p7 = scmp.ne.s32.totalorder (!%p185_p3), %s578_s16, 0 }
   0xc   : > { %p215_p6 = scmp.lt.s32.totalorder (!%p185_p3), %s214_s24, 1 }
  0x10   : > { %s714_s23 = smov (!%p223_p5, %s222_s23), 1  ;;  %s716_s24 = smov (!%p215_p6, %s214_s24), 1 }
  0x11   : > { %s494_s25 = sshll.u32 %s714_s23, 4  ;;  %s497_s26 = smul.u32 40, %s716_s24 }
  0x12   : > { %s661_s29 = scalar_lea.vmem %s702_s4, %s494_s25  ;;  %233 = sbr.rel (%p476_p7) target bundleno = 409 (0x199), region = 40 }
  0x13   : > { %s219_s6 = scalar_lea.vmem %s698_s0, %s497_s26  ;;  %p477_p8 = scmp.ne.s32.totalorder (!%p476_p7), %s574_s15, 0 }
  0x19   : > { %237 = sbr.rel (%p477_p8) target bundleno = 32 (0x20), region = 44  ;;  %vm238_vm0 = vcmask (!%p477_p8), 7168   ;;  %v592_v0 = vmov (!%p477_p8), 0.0  }
  0x1a   : > { %239 = vst.msk [vmem:[#allocation3] sm:$0xff] (!%p477_p8), %vm238_vm0, %v592_v0  ;;  %240 = vst.msk [vmem:[#allocation4] sm:$0xff] (!%p477_p8), %vm238_vm0, %v592_v0 }
  0x20 PF: > { %v541_v1 = vld [vmem:[%s219_s6 + $0x4] ss:$8 sps:$4 sm:$0xff]   ;;  %v543_v2 = vld [vmem:[%s219_s6] ss:$8 sps:$4 sm:$0xff]   ;;  %v593_v3 = vmov 0   ;;  %vm276_vm1 = vcmask 1041408  }
  0x21   : > { %315 = vmatprep.mubr.bf16.mxu0 %v593_v3  ;;  %283 = vmatprep.subr.bf16.mxu0 %v541_v1  ;;  %v544_v4 = vld [vmem:[%s219_s6 + $0x14] ss:$8 sps:$4 sm:$0xff]   ;;  %v246_v5 = vld [vmem:[%s219_s6 + $0x20] sm:$0x33]  ;;  %v546_v6 = vld [vmem:[%s219_s6 + $0x10] ss:$8 sps:$4 sm:$0xff]  }
  0x22   : > { %284 = vmatpush1.bf16.msra.mxu0 %v543_v2  ;;  %v483_v7 = vcombine.high %v246_v5, %v246_v5  ;;  %v482_v8 = vcombine.low %v246_v5, %v246_v5  ;;  %v241_v10 = vld [vmem:[%s699_s1] sm:$0xf]  ;;  %vm272_vm2 = vcmask 293888   ;;  %s495_s9 = sshll.u32 %s574_s15, 4  ;;  %vm334_vm3 = vcmask 7168   ;;  %v336_v22 = vld [vmem:[#allocation4] sm:$0xff] }
  0x23   : > { %285 = vmatprep.subr.bf16.mxu0 %v544_v4  ;;  %s326_s10 = scalar_lea.vmem [#allocation2], %s495_s9  ;;  %v329_v19 = vld [vmem:[#allocation3] sm:$0xff] }
  0x24   : > { %v278_v9 = vsel %vm276_vm1, %v482_v8, 0 }
  0x26   : > { %286 = vmatpush1.bf16.msra.mxu0 %v546_v6 }
  0x27   : > { %484 = vmatprep.subr.msk.bf16.mxu0 %vm276_vm1, %v483_v7 }
  0x2a   : > { %288 = vmatpush1.bf16.msra.mxu0 %v278_v9 }
  0x2d   : > { %485 = vmatmul.mubr.msk.bf16.vlgmr.msra.gmra.mrb[0].mxu0 %vm272_vm2, %v241_v10 }
 0x100   : > { %v317_v11 = vpop.f32.mrb[0].mxu0 }
 0x101   : > { %327 = vst [vmem:[%s326_s10] sm:$0xff] %v317_v11  ;;  %v319_v12 = vpop.f32.mrb[1].mxu0  ;;  %v337_v13 = vmul.f32 %v317_v11, %v317_v11 }
 0x102   : > { %328 = vst [vmem:[%s326_s10 + $0x8] sm:$0xff] %v319_v12  ;;  %v321_v14 = vpop.f32.mrb[2].mxu0  ;;  %v330_v15 = vadd.f32 %v319_v12, %v317_v11  ;;  %v338_v16 = vmul.f32 %v319_v12, %v319_v12 }
 0x103   : > { %v322_v17 = vpop.f32.mrb[3].mxu0 }
 0x104   : > { %331 = vadd.xlane.f32.xlu0 %v330_v15  ;;  %v339_v18 = vadd.f32 %v338_v16, %v337_v13 }
 0x108   : > { %340 = vadd.xlane.f32.xlu0 %v339_v18 }
 0x191   : > { %v332_v20 = vpop.xlane.xlu0 %331 }
 0x192   : > { %v333_v21 = vadd.f32 %v332_v20, %v329_v19 }
 0x194   : > { %335 = vst.msk [vmem:[#allocation3] sm:$0xff] %vm334_vm3, %v333_v21 }
 0x195   : > { %v341_v23 = vpop.xlane.xlu0 %340 }
 0x196   : > { %v342_v24 = vadd.f32 %v341_v23, %v336_v22 }
 0x198   : > { %343 = vst.msk [vmem:[#allocation4] sm:$0xff] %vm334_vm3, %v342_v24 }
 0x199 PF: > { %p488_p9 = scmp.ne.s32.totalorder %s578_s16, 1 }
 0x19a   : > { %p489_p10 = scmp.ne.s32.totalorder (!%p488_p9), %s574_s15, 0 }
 0x19b   : > { %347 = sbr.rel (%p488_p9) target bundleno = 587 (0x24b), region = 48 }
 0x1a2   : > { %351 = sbr.rel (%p489_p10) target bundleno = 447 (0x1bf), region = 52  ;;  %v352_v25 = vld [vmem:[#allocation3] sm:$0xff] (!%p489_p10)  ;;  %v354_v26 = vld [vmem:[#allocation4] sm:$0xff] (!%p489_p10)  ;;  %vm363_vm4 = vcmask (!%p489_p10), 7168  }
 0x1a3   : > { %v353_v27 = vmul.f32 (!%p489_p10), 0.001953125, %v352_v25  ;;  %v355_v28 = vmul.f32 (!%p489_p10), 0.001953125, %v354_v26  ;;  %v361_v33 = vld [vmem:[%s700_s2] sm:$0xff] (!%p489_p10) }
 0x1a4   : > { %v365_v36 = vld [vmem:[%s701_s3] sm:$0xff] (!%p489_p10) }
 0x1a5   : > { %v356_v29 = vmul.f32 (!%p489_p10), %v353_v27, %v353_v27 }
 0x1a7   : > { %v357_v30 = vsub.f32 (!%p489_p10), %v355_v28, %v356_v29 }
 0x1a9   : > { %v358_v31 = vmax.f32 %v357_v30, 0.0 }
 0x1ab   : > { %v359_v32 = vadd.f32 1e-05, %v358_v31 }
 0x1ad   : > { %549 = vrsqrt.f32 %v359_v32 }
 0x1b7   : > { %v550_v34 = vpop.eup %549 }
 0x1b8   : > { %v362_v35 = vmul.f32 %v550_v34, %v361_v33 }
 0x1ba   : > { %364 = vst.msk [vmem:[#allocation5] sm:$0xff] %vm363_vm4, %v362_v35  ;;  %v366_v37 = vmul.f32 %v362_v35, %v353_v27 }
 0x1bc   : > { %v367_v38 = vsub.f32 %v365_v36, %v366_v37 }
 0x1be   : > { %368 = vst.msk [vmem:[#allocation6] sm:$0xff] %vm363_vm4, %v367_v38 }
 0x1bf PF: > { %v594_v40 = vmov 0   ;;  %s496_s16 = sshll.u32 %s574_s15, 4 }
 0x1c0   : > { %551 = vset.pattern.permute.xlu0 %v594_v40  ;;  %s371_s22 = scalar_lea.vmem [#allocation2], %s496_s16 }
 0x1c1   : > { %v374_v39 = vld [vmem:[#allocation5] sm:$0xff]  ;;  %v372_v43 = vld [vmem:[%s371_s22] sm:$0xff]  ;;  %v373_v44 = vld [vmem:[%s371_s22 + $0x8] sm:$0xff] }
 0x1c2   : > { %377 = vperm.xlu0 %551, %v374_v39  }
 0x1c5   : > { %v382_v41 = vld [vmem:[#allocation6] sm:$0xff] }
 0x1c6   : > { %385 = vperm.xlu0 %551, %v382_v41  }
 0x241   : > { %v378_v42 = vpop.permute.xlu0 %377 }
 0x242   : > { %v380_v45 = vmul.f32 %v378_v42, %v372_v43  ;;  %v381_v46 = vmul.f32 %v378_v42, %v373_v44 }
 0x245   : > { %v386_v47 = vpop.permute.xlu0 %385 }
 0x246   : > { %v388_v48 = vadd.f32 %v386_v47, %v380_v45  ;;  %v389_v49 = vadd.f32 %v386_v47, %v381_v46 }
 0x248   : > { %v390_v50 = vmax.f32 %v388_v48, 0.0  ;;  %v391_v51 = vmax.f32 %v389_v49, 0.0 }
 0x24a   : > { %392 = vst [vmem:[%s661_s29] sm:$0xff] %v390_v50  ;;  %393 = vst [vmem:[%s661_s29 + $0x8] sm:$0xff] %v391_v51 }
 0x24b PF: > { %s14_s19 = sadd.s32 1, %s590_s19   ;;  %s703_s15 = smov %s582_s17 }
 0x24c   : > { %p11_p11 = scmp.ge.s32.totalorder %s14_s19, 6   ;;  %s704_s16 = smov %s586_s18 }
 0x24d   : > { %s705_s17 = smov %s708_s20  ;;  %s706_s18 = smov %s712_s21 }
 0x24e   :  { %13 = sbr.rel (!%p11_p11) target bundleno = 3 (0x3), region = 84 }

</bundles_post_ra>
